<compile_context>
chip_gen: v7x
topology: tpu7x:2x2x1
jax: 0.10.0
libtpu: 0.0.40
codegen_flags: <defaults>
</compile_context>

<pallas_src>
import functools

import jax
import jax.numpy as jnp
from jax import lax
from jax.experimental import pallas as pl
from jax.experimental.pallas import tpu as pltpu

EPS = 1e-5  # nn.InstanceNorm2d default


# ----------------------------- Pallas kernel -----------------------------
def _make_downconv_kernel(*, coutp, k, kp, tap_rel, win_len, inv_hw, two_pass):
    """Builds the kernel.  Grid = (batch, phase, lane_tile).

    x_ref:     (Cin, P_alloc)  bf16  flattened, conv-padded input (resident per batch)
    w_ref:     (2*CoutP, KP)   bf16  fused [conv | gate] weights (tap-major, ch-minor)
    g_ref:     (2*CoutP, 1)    f32   fused InstanceNorm gamma
    be_ref:    (2*CoutP, 1)    f32   fused InstanceNorm beta
    m_ref:     (1, t)          f32   stats mask tile (1 on real pixels, 0 on pad cols)
    o_ref:     (CoutP, t)      f32   output tile
    scratch:   4 x (2*CoutP,1) f32   sum / sumsq / scale / shift
    """

    def kernel(x_ref, w_ref, g_ref, be_ref, m_ref, o_ref,
               sum_ref, sq_ref, scale_ref, shift_ref):
        p = pl.program_id(1)
        j = pl.program_id(2)
        t = o_ref.shape[-1]

        # --- in-kernel im2col: aligned dynamic window load + 9 static tap slices ---
        base = pl.multiple_of(j * t, 128)
        win = x_ref[:, pl.ds(base, win_len)].astype(jnp.float32)     # (Cin, win_len)
        pieces = [win[:, r:r + t] for r in tap_rel]                   # 9 x (Cin, t)
        if kp > k:
            pieces.append(jnp.zeros((kp - k, t), jnp.float32))        # K pad to 16
        patches = jnp.concatenate(pieces, axis=0).astype(jnp.bfloat16)  # (KP, t)

        # Both conv branches in a single MXU matmul (bf16 inputs, f32 accumulation).
        conv = jnp.dot(w_ref[...], patches, preferred_element_type=jnp.float32)

        def partial_stats():
            cm = conv * m_ref[...]                                    # mask pad columns
            s = jnp.sum(cm, axis=1, keepdims=True)                    # lane-axis reduce
            sq = jnp.sum(conv * cm, axis=1, keepdims=True)
            return s, sq

        def scale_shift(s, sq):
            mu = s * inv_hw
            var = jnp.maximum(sq * inv_hw - mu * mu, 0.0)             # clamp vs cancellation
            sc = g_ref[...] * lax.rsqrt(var + EPS)
            return sc, be_ref[...] - mu * sc

        def gated(sc, sh):
            y = conv * sc + sh                                        # fused scale/shift
            return y[:coutp, :] * jax.nn.sigmoid(y[coutp:, :])

        if not two_pass:
            # Whole band fits in one lane tile: single pass, no recompute.
            s, sq = partial_stats()
            sc, sh = scale_shift(s, sq)
            o_ref[...] = gated(sc, sh)
        else:
            @pl.when(p == 0)
            def _accumulate():
                s, sq = partial_stats()

                @pl.when(j == 0)
                def _init():
                    sum_ref[...] = jnp.zeros_like(sum_ref)
                    sq_ref[...] = jnp.zeros_like(sq_ref)

                sum_ref[...] += s
                sq_ref[...] += sq

            @pl.when(p == 1)
            def _write():
                @pl.when(j == 0)
                def _finalize():
                    sc, sh = scale_shift(sum_ref[...], sq_ref[...])
                    scale_ref[...] = sc
                    shift_ref[...] = sh

                o_ref[...] = gated(scale_ref[...], shift_ref[...])

    return kernel


# ----------------------------- JAX glue -----------------------------
def _round_up(x, m):
    return (x + m - 1) // m * m


def _vmem_limit_bytes():
    # Review: do not hard-code 64 MiB (the whole physical VMEM on v7x, and an
    # unnecessarily low cap on v5e/v6e).  Use ~85% of the queried capacity.
    try:
        return int(pltpu.get_tpu_info().vmem_capacity_bytes * 0.85)
    except Exception:
        return None  # fall back to the compiler default scoped limit


def downconv_forward(x, params, *, max_lane_tile=8192):
    """DownConv forward.  x: (N, Cin, H, W) float32.  Returns (N, Cout, H, W) float32."""
    n, cin, h, w = x.shape
    wp2 = w + 2                     # conv-padded row width (band carries wp2 cols/row)
    band = h * wp2                  # flattened output band length (2 discard cols/row)
    hw = h * w
    k = cin * 9
    kp = _round_up(k, 16)           # bf16 sublane packing
    cout = params["w1"].shape[0]
    coutp = _round_up(cout, 8)

    # Lane tile: as large as VMEM headroom allows (fewer grid steps, less fixed overhead).
    per_lane_bytes = 6 * kp + 32 * coutp + 8      # rough per-lane intermediate footprint
    t_cap = max(128, (24 * 1024 * 1024 // per_lane_bytes) // 128 * 128)
    t = min(_round_up(band, 128), _round_up(max_lane_tile, 128), t_cap)
    band_p = _round_up(band, t)
    n_t = band_p // t
    two_pass = n_t > 1
    n_phase = 2 if two_pass else 1

    # Flattened, conv-padded input.  Layout: [wp2 dummy zeros | (H+2)x(W+2) zero-padded
    # image | tail zeros].  Output band position i (= r*wp2 + c) lives at absolute index
    # q0 + i with q0 = 2*wp2; tap (kh,kw) reads q0 + i + (kh-1)*wp2 + (kw-1), which stays
    # in-bounds for every (including discarded) band position.
    q0 = 2 * wp2
    win_len = _round_up(t + 3 * w + 7, 128)       # aligned window covering all 9 taps
    p_alloc = _round_up(band_p - t + win_len, 128)
    xpad = jnp.pad(x, ((0, 0), (0, 0), (1, 1), (1, 1))).reshape(n, cin, (h + 2) * wp2)
    tail = p_alloc - wp2 - (h + 2) * wp2
    xflat = jnp.pad(xpad, ((0, 0), (0, 0), (wp2, tail))).astype(jnp.bfloat16)

    # Static in-window offsets of the 9 taps (kh-major, kw-minor).
    tap_rel = tuple(q0 + (kh - 1) * wp2 + (kw - 1) for kh in range(3) for kw in range(3))

    # Fused [conv | gate] weights, (2*CoutP, KP), tap-major / channel-minor to match the
    # in-kernel patch build.  Conv biases intentionally omitted (cancelled by the norm).
    def flat_w(wt):
        wt2 = jnp.transpose(wt, (0, 2, 3, 1)).reshape(cout, k)
        return jnp.pad(wt2, ((0, coutp - cout), (0, kp - k)))

    w_fused = jnp.concatenate([flat_w(params["w1"]), flat_w(params["w2"])],
                              axis=0).astype(jnp.bfloat16)

    def flat_affine(v):
        return jnp.pad(v.reshape(cout, 1), ((0, coutp - cout), (0, 0))).astype(jnp.float32)

    g_fused = jnp.concatenate([flat_affine(params["g1"]), flat_affine(params["g2"])], axis=0)
    be_fused = jnp.concatenate([flat_affine(params["be1"]), flat_affine(params["be2"])], axis=0)

    # Stats mask: 1.0 on real pixels of the band, 0.0 on the per-row discard columns and
    # the tail padding.  Normalisation divides by the true H*W.
    pos = jnp.arange(band_p)
    col = pos % wp2
    mask = ((pos < band) & (col >= 1) & (col <= w)).astype(jnp.float32).reshape(1, band_p)

    kernel = _make_downconv_kernel(coutp=coutp, k=k, kp=kp, tap_rel=tap_rel,
                                   win_len=win_len, inv_hw=1.0 / hw, two_pass=two_pass)

    cp_kwargs = dict(dimension_semantics=("parallel", "arbitrary", "arbitrary"))
    lim = _vmem_limit_bytes()
    if lim is not None:
        cp_kwargs["vmem_limit_bytes"] = lim

    out = pl.pallas_call(
        kernel,
        out_shape=jax.ShapeDtypeStruct((n, coutp, band_p), jnp.float32),
        grid_spec=pltpu.PrefetchScalarGridSpec(
            num_scalar_prefetch=0,
            grid=(n, n_phase, n_t),
            in_specs=[
                # Raw padded input, resident for the whole (phase, tile) sub-grid of a batch.
                pl.BlockSpec((None, cin, p_alloc), lambda b, p, j: (b, 0, 0)),
                pl.BlockSpec((2 * coutp, kp), lambda b, p, j: (0, 0)),   # fused weights
                pl.BlockSpec((2 * coutp, 1), lambda b, p, j: (0, 0)),    # fused gamma
                pl.BlockSpec((2 * coutp, 1), lambda b, p, j: (0, 0)),    # fused beta
                pl.BlockSpec((1, t), lambda b, p, j: (0, j)),            # stats mask tile
            ],
            # During the stats phase every step maps to tile 0 (never written -> no extra
            # writeback); the apply phase writes each lane-dense tile exactly once.
            out_specs=pl.BlockSpec((None, coutp, t), lambda b, p, j: (b, 0, p * j)),
            scratch_shapes=[pltpu.VMEM((2 * coutp, 1), jnp.float32)] * 4,
        ),
        compiler_params=pltpu.CompilerParams(**cp_kwargs),
    )(xflat, w_fused, g_fused, be_fused, mask)

    # Slice off channel pad, tail pad and the 2 discard columns per row; free reshape.
    out = out[:, :cout, :band].reshape(n, cout, h, wp2)
    return out[:, :, :, 1:w + 1]


# ----------------------------- Pure-JAX reference -----------------------------
def downconv_reference(x, params):
    # Matches the kernel's bf16 input/weight rounding; conv + stats in f32.
    xb = x.astype(jnp.bfloat16).astype(jnp.float32)

    def conv_in(wt, b, g, be):
        wb = wt.astype(jnp.bfloat16).astype(jnp.float32)
        c = lax.conv_general_dilated(
            xb, wb, window_strides=(1, 1), padding=((1, 1), (1, 1)),
            dimension_numbers=("NCHW", "OIHW", "NCHW"),
            precision=lax.Precision.HIGHEST)
        c = c + b.reshape(1, -1, 1, 1)   # kernel omits this: cancelled by the norm
        mu = jnp.mean(c, axis=(2, 3), keepdims=True)
        var = jnp.mean((c - mu) ** 2, axis=(2, 3), keepdims=True)
        return ((c - mu) * lax.rsqrt(var + EPS)) * g.reshape(1, -1, 1, 1) + be.reshape(1, -1, 1, 1)

    hmap = conv_in(params["w1"], params["b1"], params["g1"], params["be1"])
    gate = conv_in(params["w2"], params["b2"], params["g2"], params["be2"])
    return hmap * jax.nn.sigmoid(gate)


# ----------------------------- main -----------------------------
if __name__ == "__main__":
    key = jax.random.PRNGKey(0)
    ks = jax.random.split(key, 9)

    N, Cin, H, W = 2, 4, 16, 16
    Cout = 8

    x = jax.random.normal(ks[0], (N, Cin, H, W), jnp.float32)

    fan_in = Cin * 9
    params = {
        "w1": jax.random.normal(ks[1], (Cout, Cin, 3, 3), jnp.float32) / jnp.sqrt(fan_in),
        "b1": 0.1 * jax.random.normal(ks[2], (Cout,), jnp.float32),
        "g1": 1.0 + 0.1 * jax.random.normal(ks[3], (Cout,), jnp.float32),
        "be1": 0.1 * jax.random.normal(ks[4], (Cout,), jnp.float32),
        "w2": jax.random.normal(ks[5], (Cout, Cin, 3, 3), jnp.float32) / jnp.sqrt(fan_in),
        "b2": 0.1 * jax.random.normal(ks[6], (Cout,), jnp.float32),
        "g2": 1.0 + 0.1 * jax.random.normal(ks[7], (Cout,), jnp.float32),
        "be2": 0.1 * jax.random.normal(ks[8], (Cout,), jnp.float32),
    }

    ref = jax.block_until_ready(downconv_reference(x, params))

    # Single-tile (one-pass) path: whole band fits in one lane tile.
    out = jax.block_until_ready(downconv_forward(x, params))
    assert out.shape == (N, Cout, H, W), out.shape
    err = float(jnp.max(jnp.abs(out - ref)))
    assert jnp.allclose(out, ref, rtol=1e-3, atol=1e-3), err

    # Streaming two-phase path (tiny lane tiles -> multiple HW tiles, stats + apply).
    out2 = jax.block_until_ready(downconv_forward(x, params, max_lane_tile=128))
    err2 = float(jnp.max(jnp.abs(out2 - ref)))
    assert jnp.allclose(out2, ref, rtol=1e-3, atol=1e-3), err2

    print("KERNEL_OK")
</pallas_src>

<mosaic_0001>
module attributes {stable_mosaic.version = 11 : i64} {
  func.func @kernel(%arg0: i32, %arg1: i32, %arg2: i32, %arg3: memref<1x4x512xbf16, #tpu.memory_space<vmem>>, %arg4: memref<16x48xbf16, #tpu.memory_space<vmem>>, %arg5: memref<16x1xf32, #tpu.memory_space<vmem>>, %arg6: memref<16x1xf32, #tpu.memory_space<vmem>>, %arg7: memref<1x384xf32, #tpu.memory_space<vmem>>, %arg8: memref<1x8x384xf32, #tpu.memory_space<vmem>>, %arg9: memref<16x1xf32, #tpu.memory_space<vmem>>, %arg10: memref<16x1xf32, #tpu.memory_space<vmem>>, %arg11: memref<16x1xf32, #tpu.memory_space<vmem>>, %arg12: memref<16x1xf32, #tpu.memory_space<vmem>>) attributes {dimension_semantics = [#tpu.dimension_semantics<parallel>, #tpu.dimension_semantics<arbitrary>, #tpu.dimension_semantics<arbitrary>], iteration_bounds = array<i64: 2, 1, 1>, scalar_prefetch = 0 : i64, scratch_operands = 4 : i64, tpu.core_type = #tpu.core_type<tc>, window_params = [{transform_indices = @transform_0, window_bounds = array<i64: 1, 4, 512>}, {pipeline_mode = #tpu.pipeline_mode<synchronous>, transform_indices = @transform_1, window_bounds = array<i64: 16, 48>}, {pipeline_mode = #tpu.pipeline_mode<synchronous>, transform_indices = @transform_2, window_bounds = array<i64: 16, 1>}, {pipeline_mode = #tpu.pipeline_mode<synchronous>, transform_indices = @transform_3, window_bounds = array<i64: 16, 1>}, {transform_indices = @transform_4, window_bounds = array<i64: 1, 384>}, {transform_indices = @transform_5, window_bounds = array<i64: 1, 8, 384>}]} {
    %c384_i32 = arith.constant 384 : i32
    %0 = arith.muli %arg2, %c384_i32 : i32
    %1 = tpu.assume_multiple %0, 128 : i32
    %c0 = arith.constant 0 : index
    %c0_0 = arith.constant 0 : index
    %2 = arith.index_cast %1 : i32 to index
    %3 = vector.load %arg3[%c0, %c0_0, %2] : memref<1x4x512xbf16, #tpu.memory_space<vmem>>, vector<1x4x512xbf16>
    %4 = vector.shape_cast %3 : vector<1x4x512xbf16> to vector<4x512xbf16>
    %5 = arith.extf %4 : vector<4x512xbf16> to vector<4x512xf32>
    %6 = vector.extract_strided_slice %5 {offsets = [0, 17], sizes = [4, 384], strides = [1, 1]} : vector<4x512xf32> to vector<4x384xf32>
    %7 = vector.extract_strided_slice %5 {offsets = [0, 18], sizes = [4, 384], strides = [1, 1]} : vector<4x512xf32> to vector<4x384xf32>
    %8 = vector.extract_strided_slice %5 {offsets = [0, 19], sizes = [4, 384], strides = [1, 1]} : vector<4x512xf32> to vector<4x384xf32>
    %9 = vector.extract_strided_slice %5 {offsets = [0, 35], sizes = [4, 384], strides = [1, 1]} : vector<4x512xf32> to vector<4x384xf32>
    %10 = vector.extract_strided_slice %5 {offsets = [0, 36], sizes = [4, 384], strides = [1, 1]} : vector<4x512xf32> to vector<4x384xf32>
    %11 = vector.extract_strided_slice %5 {offsets = [0, 37], sizes = [4, 384], strides = [1, 1]} : vector<4x512xf32> to vector<4x384xf32>
    %12 = vector.extract_strided_slice %5 {offsets = [0, 53], sizes = [4, 384], strides = [1, 1]} : vector<4x512xf32> to vector<4x384xf32>
    %13 = vector.extract_strided_slice %5 {offsets = [0, 54], sizes = [4, 384], strides = [1, 1]} : vector<4x512xf32> to vector<4x384xf32>
    %14 = vector.extract_strided_slice %5 {offsets = [0, 55], sizes = [4, 384], strides = [1, 1]} : vector<4x512xf32> to vector<4x384xf32>
    %cst = arith.constant 0.000000e+00 : f32
    %15 = vector.broadcast %cst : f32 to vector<12x384xf32>
    %16 = tpu.concatenate %6, %7, %8, %9, %10, %11, %12, %13, %14, %15 in 0 : vector<4x384xf32>, vector<4x384xf32>, vector<4x384xf32>, vector<4x384xf32>, vector<4x384xf32>, vector<4x384xf32>, vector<4x384xf32>, vector<4x384xf32>, vector<4x384xf32>, vector<12x384xf32> -> vector<48x384xf32>
    %17 = arith.truncf %16 : vector<48x384xf32> to vector<48x384xbf16>
    %c0_1 = arith.constant 0 : index
    %c0_2 = arith.constant 0 : index
    %18 = vector.load %arg4[%c0_1, %c0_2] : memref<16x48xbf16, #tpu.memory_space<vmem>>, vector<16x48xbf16>
    %cst_3 = arith.constant dense<0.000000e+00> : vector<16x384xf32>
    %19 = tpu.matmul %18, %17, %cst_3 {dimension_numbers = #tpu.dot_dimension_numbers<[1], [0], [0], [1], [0, 0, 1, 1], [], []>} : vector<16x48xbf16>, vector<48x384xbf16>, vector<16x384xf32> -> vector<16x384xf32>
    %c0_4 = arith.constant 0 : index
    %c0_5 = arith.constant 0 : index
    %20 = vector.load %arg7[%c0_4, %c0_5] : memref<1x384xf32, #tpu.memory_space<vmem>>, vector<1x384xf32>
    %21 = vector.broadcast %20 : vector<1x384xf32> to vector<16x384xf32>
    %22 = arith.mulf %19, %21 : vector<16x384xf32>
    %cst_6 = arith.constant dense<0.000000e+00> : vector<16xf32>
    %23 = vector.multi_reduction <add>, %22, %cst_6 [1] : vector<16x384xf32> to vector<16xf32>
    %24 = vector.shape_cast %23 : vector<16xf32> to vector<16x1xf32>
    %25 = arith.mulf %19, %22 : vector<16x384xf32>
    %cst_7 = arith.constant dense<0.000000e+00> : vector<16xf32>
    %26 = vector.multi_reduction <add>, %25, %cst_7 [1] : vector<16x384xf32> to vector<16xf32>
    %27 = vector.shape_cast %26 : vector<16xf32> to vector<16x1xf32>
    %cst_8 = arith.constant 3.906250e-03 : f32
    %28 = vector.broadcast %cst_8 : f32 to vector<16x1xf32>
    %29 = arith.mulf %24, %28 : vector<16x1xf32>
    %cst_9 = arith.constant 3.906250e-03 : f32
    %30 = vector.broadcast %cst_9 : f32 to vector<16x1xf32>
    %31 = arith.mulf %27, %30 : vector<16x1xf32>
    %32 = arith.mulf %29, %29 : vector<16x1xf32>
    %33 = arith.subf %31, %32 : vector<16x1xf32>
    %cst_10 = arith.constant 0.000000e+00 : f32
    %34 = vector.broadcast %cst_10 : f32 to vector<16x1xf32>
    %35 = arith.maximumf %33, %34 : vector<16x1xf32>
    %c0_11 = arith.constant 0 : index
    %c0_12 = arith.constant 0 : index
    %36 = vector.load %arg5[%c0_11, %c0_12] : memref<16x1xf32, #tpu.memory_space<vmem>>, vector<16x1xf32>
    %cst_13 = arith.constant 9.99999974E-6 : f32
    %37 = vector.broadcast %cst_13 : f32 to vector<16x1xf32>
    %38 = arith.addf %35, %37 : vector<16x1xf32>
    %39 = math.rsqrt %38 : vector<16x1xf32>
    %40 = arith.mulf %36, %39 : vector<16x1xf32>
    %c0_14 = arith.constant 0 : index
    %c0_15 = arith.constant 0 : index
    %41 = vector.load %arg6[%c0_14, %c0_15] : memref<16x1xf32, #tpu.memory_space<vmem>>, vector<16x1xf32>
    %42 = arith.mulf %29, %40 : vector<16x1xf32>
    %43 = arith.subf %41, %42 : vector<16x1xf32>
    %44 = vector.broadcast %40 : vector<16x1xf32> to vector<16x384xf32>
    %45 = arith.mulf %19, %44 : vector<16x384xf32>
    %46 = vector.broadcast %43 : vector<16x1xf32> to vector<16x384xf32>
    %47 = arith.addf %45, %46 : vector<16x384xf32>
    %48 = vector.extract_strided_slice %47 {offsets = [0, 0], sizes = [8, 384], strides = [1, 1]} : vector<16x384xf32> to vector<8x384xf32>
    %49 = vector.extract_strided_slice %47 {offsets = [8, 0], sizes = [8, 384], strides = [1, 1]} : vector<16x384xf32> to vector<8x384xf32>
    %50 = arith.negf %49 : vector<8x384xf32>
    %51 = math.exp %50 : vector<8x384xf32>
    %cst_16 = arith.constant 1.000000e+00 : f32
    %52 = vector.broadcast %cst_16 : f32 to vector<8x384xf32>
    %53 = arith.addf %52, %51 : vector<8x384xf32>
    %54 = arith.divf %52, %53 : vector<8x384xf32>
    %55 = arith.mulf %48, %54 : vector<8x384xf32>
    %c0_17 = arith.constant 0 : index
    %c0_18 = arith.constant 0 : index
    %c0_19 = arith.constant 0 : index
    %56 = vector.load %arg8[%c0_17, %c0_18, %c0_19] : memref<1x8x384xf32, #tpu.memory_space<vmem>>, vector<1x8x384xf32>
    %57 = vector.shape_cast %56 : vector<1x8x384xf32> to vector<8x384xf32>
    %58 = vector.shape_cast %55 : vector<8x384xf32> to vector<1x8x384xf32>
    tpu.vector_store %arg8[%c0_17, %c0_18, %c0_19], %58 {strides = array<i32>} : memref<1x8x384xf32, #tpu.memory_space<vmem>>, vector<1x8x384xf32>,
    return
  }
  func.func @transform_0(%arg0: i32, %arg1: i32, %arg2: i32) -> (i32, i32, i32) {
    %c0_i32 = arith.constant 0 : i32
    %c0_i32_0 = arith.constant 0 : i32
    %c0_i32_1 = arith.constant 0 : i32
    return %arg0, %c0_i32, %c0_i32_0 : i32, i32, i32
  }
  func.func @transform_1(%arg0: i32, %arg1: i32, %arg2: i32) -> (i32, i32) {
    %c0_i32 = arith.constant 0 : i32
    %c0_i32_0 = arith.constant 0 : i32
    %c0_i32_1 = arith.constant 0 : i32
    return %c0_i32, %c0_i32_0 : i32, i32
  }
  func.func @transform_2(%arg0: i32, %arg1: i32, %arg2: i32) -> (i32, i32) {
    %c0_i32 = arith.constant 0 : i32
    %c0_i32_0 = arith.constant 0 : i32
    %c0_i32_1 = arith.constant 0 : i32
    return %c0_i32, %c0_i32_0 : i32, i32
  }
  func.func @transform_3(%arg0: i32, %arg1: i32, %arg2: i32) -> (i32, i32) {
    %c0_i32 = arith.constant 0 : i32
    %c0_i32_0 = arith.constant 0 : i32
    %c0_i32_1 = arith.constant 0 : i32
    return %c0_i32, %c0_i32_0 : i32, i32
  }
  func.func @transform_4(%arg0: i32, %arg1: i32, %arg2: i32) -> (i32, i32) {
    %c0_i32 = arith.constant 0 : i32
    %c0_i32_0 = arith.constant 0 : i32
    return %c0_i32, %arg2 : i32, i32
  }
  func.func @transform_5(%arg0: i32, %arg1: i32, %arg2: i32) -> (i32, i32, i32) {
    %0 = arith.muli %arg1, %arg2 : i32
    %c0_i32 = arith.constant 0 : i32
    %c0_i32_0 = arith.constant 0 : i32
    return %arg0, %c0_i32, %0 : i32, i32, i32
  }
}

</mosaic_0001>

<bundles_post_ra>
// kernel: tpu_custom_call.1
= control target key start
LH: loop header
LB: loop body
LE: loop exit
PB: predicated region body
PF: predicated region fallthrough
CT: control target
= control target key end

     0   :  { %10 = vsyncpa [#allocation7], 0  ;;  %s1405_s0 = inlined_call_operand.vmem [shape: bf16[2,4,512], index: 0, kind: input, shape index: {}]   ;;  %s1406_s1 = inlined_call_operand.vmem [shape: bf16[16,48], index: 1, kind: input, shape index: {}]   ;;  %s1407_s2 = inlined_call_operand.vmem [shape: f32[16,1], index: 2, kind: input, shape index: {}]   ;;  %s1408_s3 = inlined_call_operand.vmem [shape: f32[16,1], index: 3, kind: input, shape index: {}]   ;;  %s1409_s4 = inlined_call_operand.vmem [shape: f32[1,384], index: 4, kind: input, shape index: {}]   ;;  %s1410_s5 = inlined_call_operand.hbm [shape: f32[2,8,384], index: 5, kind: output, shape index: {}]  }
   0x1   :  { %12 = vsyncpa [#allocation7 + $0x1], 0  ;;  %s1148_s18 = smov 0   ;;  %s1150_s19 = smov 0  }
   0x2   :  { %s1152_s20 = smov 0   ;;  %s1154_s21 = smov 0  }
   0x3   :  { %s1156_s22 = smov 0   ;;  %s1158_s23 = smov 0  }
   0x4 LB: > { %s825_s24 = sadd.s32 4294967295, %s1103_s23   ;;  %s826_s25 = sadd.s32 4294967294, %s1103_s23   ;;  %s1103_s23 = sphi %s1158_s23, %s18_s23   ;;  %s1099_s22 = sphi %s1156_s22, %s1417_s22   ;;  %s1095_s21 = sphi %s1154_s21, %s1416_s21   ;;  %s1091_s20 = sphi %s1152_s20, %s1415_s20   ;;  %s1087_s19 = sphi %s1150_s19, %s1414_s19   ;;  %s1083_s18 = sphi %s1148_s18, %s1413_s18  }
   0x5   : > { %s37_s26 = sadd.s32 1, %s1099_s22  ;;  %s163_s27 = sadd.s32 1, %s1091_s20 }
   0x6   : > { %p39_p0 = scmp.ge.s32.totalorder %s37_s26, 2  ;;  %p173_p1 = scmp.ne.s32.totalorder %s1091_s20, %s1087_s19 }
   0x7   : > { %p174_p2 = scmp.eq.s32.totalorder %s825_s24, 1  ;;  %p179_p3 = scmp.ne.s32.totalorder %s1087_s19, %s1083_s18 }
   0x8   : > { %s1419_s26 = smov (%p39_p0, %s37_s26), 0  ;;  %p180_p5 = scmp.eq.s32.totalorder %s826_s25, 1 }
   0x9   : > { %p1188_p4 = por %p174_p2, %p173_p1  ;;  %s158_s29 = ssub.s32 %s1099_s22, %s1419_s26 }
   0xa   : > { %p830_p6 = scmp.ge.s32.totalorder %s1103_s23, 1  ;;  %p161_p7 = scmp.eq.s32.totalorder %s158_s29, 0 }
   0xb   : > { %p1195_p8 = por %p180_p5, %p179_p3  ;;  %p223_p9 = scmp.lt.s32.totalorder %s1103_s23, 3 }
   0xc   : > { %s1201_s6 = scalar_select %p161_p7, %s1091_s20, %s163_s27  }
   0xd   : > { %p224_p10 = pnand %p830_p6, %p223_p9 }
   0xe   : > { %p255_p11 = scmp.lt.s32.totalorder (!%p224_p10), %s1095_s21, 1  ;;  %s1105_s12 = smov (!%p224_p10), 127   ;;  %v1112_v11 = vmov (!%p224_p10), 0.0   ;;  %vm292_vm0 = vcmask (!%p224_p10), 1039360   ;;  %vm308_vm1 = vcmask (!%p224_p10), 1031168   ;;  %vm324_vm2 = vcmask (!%p224_p10), 900096  }
   0xf   : > { %227 = sbr.rel (%p224_p10) target bundleno = 873 (0x369), region = 40  ;;  %s1106_s13 = smov (!%p224_p10), 126   ;;  %847 = vmatprep.subr.bf16.mxu1 (!%p224_p10), %v1112_v11  ;;  %vm412_vm3 = vcmask (!%p224_p10), 1043456   ;;  %vm340_vm4 = vcmask (!%p224_p10), 891904   ;;  %vm356_vm5 = vcmask (!%p224_p10), 883712   ;;  %vm372_vm6 = vcmask (!%p224_p10), 752640  }
  0x10   : > { %s1107_s14 = smov (!%p224_p10), 110   ;;  %s1108_s15 = smov (!%p224_p10), 109   ;;  %vm388_vm7 = vcmask (!%p224_p10), 744448   ;;  %vm404_vm8 = vcmask (!%p224_p10), 736256   ;;  %vm1116_vm9 = vmmov (!%p224_p10), 0   ;;  %vm488_vm10 = vcmask (!%p224_p10), 908288  }
  0x11   : > { %s1109_s16 = smov (!%p224_p10), 108   ;;  %s1110_s17 = smov (!%p224_p10), 92   ;;  %853 = vmatprep.mubr.msk.bf16.mxu1 (!%p224_p10), %vm1116_vm9, %v1112_v11  ;;  %vm507_vm11 = vcmask (!%p224_p10), 392192  }
  0x12   : > { %s1111_s24 = smov (!%p224_p10), 91   ;;  %s1113_s25 = smov (!%p224_p10), 90  }
  0x13   : > { %s1114_s27 = smov (!%p224_p10), 111  }
  0x16   : > { %s256_s7 = scalar_select %p255_p11, %s1095_s21, 1 }
  0x18   : > { %s842_s8 = sshll.u32 %s256_s7, 3 }
  0x19   : > { %s259_s11 = scalar_lea.vmem %s1405_s0, %s842_s8 }
  0x1a   : > { %v273_v0 = vld [vmem:[%s259_s11] sm:$0xff] }
  0x1b   : > { %v1208_v1 = vunpack.c.l.bf16 %v273_v0  ;;  %v1210_v2 = vunpack.c.h.bf16 %v273_v0 }
  0x1d   : > { %v283_v3 = vcombine.low %v1210_v2, %v1210_v2  ;;  %v1216_v4 = vcombine.high %v1208_v1, %v1208_v1  ;;  %v282_v5 = vcombine.low %v1208_v1, %v1208_v1  ;;  %v279_v6 = vcombine.high %v1210_v2, %v1210_v2 }
  0x1f   : > { %v926_v7 = vpack.i.bf16 %v283_v3, %v1208_v1  ;;  %v936_v8 = vpack.i.bf16 %v1210_v2, %v1216_v4  ;;  %v931_v9 = vpack.i.bf16 %v282_v5, %v1210_v2  ;;  %v941_v10 = vpack.i.bf16 %v1208_v1, %v279_v6 }
  0x21   : > { %927 = vrot.lane.b32.xlu0 %v926_v7, %s1105_s12  ;;  %937 = vrot.lane.b32.xlu1 %v936_v8, %s1106_s13 }
  0x25   : > { %932 = vrot.lane.b32.xlu0 %v931_v9, %s1105_s12  ;;  %942 = vrot.lane.b32.xlu1 %v941_v10, %s1106_s13  ;;  %s1117_s12 = smov [#allocation6]  }
  0x26   : > { %s1029_s13 = sshll.u32 %s1117_s12, 4  ;;  %s1030_s13 = int_to_ptr.vmem [resolvable:$false] %s1029_s13 }
  0x29   : > { %947 = vrot.lane.b32.xlu0 %v926_v7, %s1107_s14  ;;  %952 = vrot.lane.b32.xlu1 %v931_v9, %s1107_s14  ;;  %s1031_s14 = scalar_lea.vmem %s1030_s13, 768 }
  0x2d   : > { %957 = vrot.lane.b32.xlu0 %v936_v8, %s1108_s15  ;;  %962 = vrot.lane.b32.xlu1 %v941_v10, %s1108_s15 }
  0x31   : > { %967 = vrot.lane.b32.xlu0 %v926_v7, %s1109_s16  ;;  %972 = vrot.lane.b32.xlu1 %v931_v9, %s1109_s16 }
  0x35   : > { %977 = vrot.lane.b32.xlu0 %v936_v8, %s1110_s17  ;;  %982 = vrot.lane.b32.xlu1 %v941_v10, %s1110_s17 }
  0x39   : > { %987 = vrot.lane.b32.xlu0 %v926_v7, %s1111_s24  ;;  %992 = vrot.lane.b32.xlu1 %v931_v9, %s1111_s24  ;;  %s252_s24 = sand.u32 1, %s1087_s19  }
  0x3d   : > { %997 = vrot.lane.b32.xlu0 %v936_v8, %s1113_s25  ;;  %1002 = vrot.lane.b32.xlu1 %v941_v10, %s1113_s25  ;;  %s857_s25 = smul.u32 24, %s252_s24 }
  0x3f   : > { %s254_s29 = scalar_lea.vmem [#allocation6], %s857_s25 }
  0x40   : > { %s738_s7 = sshll.u32 %s254_s29, 4  ;;  %s1360_s7 = int_to_ptr.vmem [resolvable:$true] %s738_s7 }
  0x41   : > { %s1025_s11 = scalar_lea.vmem %s1360_s7, 384  ;;  %p1032_p1 = scmp.lt.s32.totalorder %s1360_s7, %s1030_s13 }
  0x42   : > { %p1026_p12 = scmp.ne.s32.totalorder %s1360_s7, %s1025_s11  ;;  %p1033_p2 = scmp.lt.s32.totalorder %s1031_s14, %s1025_s11 }
  0x44   : > { %p1027_p13 = pnand %p1026_p12, %p1188_p4  ;;  %p1034_p3 = por %p1033_p2, %p1032_p1 }
  0x46   : > { %p1028_p0 = pneg %p1027_p13 }
  0x48   : > { %p1035_p5 = pnand %p1034_p3, %p1028_p0 }
  0x93   : > { %v928_v12 = vpop.permute.xlu0 %927  ;;  %v938_v13 = vpop.permute.xlu1 %937 }
  0x94   : > { %v930_v16 = vunpack.i.h.bf16 %v928_v12  ;;  %v929_v17 = vunpack.i.l.bf16 %v928_v12  ;;  %v940_v18 = vunpack.i.h.bf16 %v938_v13  ;;  %v939_v19 = vunpack.i.l.bf16 %v938_v13 }
  0x96   : > { %v294_v28 = vsel %vm292_vm0, %v929_v17, %v930_v16  ;;  %v310_v31 = vsel %vm308_vm1, %v939_v19, %v940_v18 }
  0x97   : > { %v933_v14 = vpop.permute.xlu0 %932  ;;  %v943_v15 = vpop.permute.xlu1 %942  ;;  %v414_v40 = vsel %vm412_vm3, %v1216_v4, %v294_v28 }
  0x98   : > { %v934_v20 = vunpack.i.l.bf16 %v933_v14  ;;  %v944_v21 = vunpack.i.l.bf16 %v943_v15  ;;  %v935_v29 = vunpack.i.h.bf16 %v933_v14  ;;  %v945_v30 = vunpack.i.h.bf16 %v943_v15 }
  0x9a   : > { %v416_v33 = vsel %vm412_vm3, %v279_v6, %v934_v20  ;;  %v293_v41 = vsel %vm292_vm0, %v935_v29, %v929_v17  ;;  %v309_v42 = vsel %vm308_vm1, %v945_v30, %v939_v19  ;;  %v295_v53 = vsel %vm292_vm0, %v930_v16, %v934_v20 }
  0x9b   : > { %v948_v22 = vpop.permute.xlu0 %947  ;;  %v953_v23 = vpop.permute.xlu1 %952  ;;  %v413_v47 = vsel %vm412_vm3, %v1208_v1, %v293_v41  ;;  %v311_v54 = vsel %vm308_vm1, %v940_v18, %v944_v21  ;;  %v415_v30 = vsel %vm412_vm3, %v1210_v2, %v295_v53 }
  0x9c   : > { %v950_v24 = vunpack.i.h.bf16 %v948_v22  ;;  %v949_v25 = vunpack.i.l.bf16 %v948_v22  ;;  %v955_v26 = vunpack.i.h.bf16 %v953_v23  ;;  %v954_v27 = vunpack.i.l.bf16 %v953_v23 }
  0x9e   : > { %v326_v32 = vsel %vm324_vm2, %v949_v25, %v950_v24  ;;  %v420_v34 = vsel %vm412_vm3, %v944_v21, %v954_v27  ;;  %v325_v35 = vsel %vm324_vm2, %v955_v26, %v949_v25  ;;  %v327_v58 = vsel %vm324_vm2, %v950_v24, %v954_v27 }
  0x9f   : > { %v1234_v36 = vpop.permute.xlu0 %957  ;;  %v1236_v37 = vpop.permute.xlu1 %962  ;;  %v436_v38 = vpack.c.bf16 %v420_v34, %v416_v33  ;;  %v418_v39 = vsel %vm412_vm3, %v310_v31, %v326_v32  ;;  %v417_v44 = vsel %vm412_vm3, %v309_v42, %v325_v35  ;;  %v419_v13 = vsel %vm412_vm3, %v311_v54, %v327_v58 }
  0xa0   : > { %v434_v43 = vpack.c.bf16 %v418_v39, %v414_v40  ;;  %v433_v48 = vpack.c.bf16 %v417_v44, %v413_v47  ;;  %v960_v55 = vunpack.i.h.bf16 %v1234_v36  ;;  %v959_v56 = vunpack.i.l.bf16 %v1234_v36 }
  0xa1   : > { %470 = vrot.lane.b32.xlu1 %v436_v38, %s1114_s27  ;;  %v964_v59 = vunpack.i.l.bf16 %v1236_v37  ;;  %v965_v10 = vunpack.i.h.bf16 %v1236_v37  ;;  %v435_v34 = vpack.c.bf16 %v419_v13, %v415_v30 }
  0xa2   : > { %466 = vrot.lane.b32.xlu0 %v434_v43, %s1114_s27  ;;  %v342_v9 = vsel %vm340_vm4, %v959_v56, %v960_v55 }
  0xa3   : > { %v1246_v45 = vpop.permute.xlu0 %967  ;;  %v973_v46 = vpop.permute.xlu1 %972  ;;  %v341_v32 = vsel %vm340_vm4, %v965_v10, %v959_v56  ;;  %v343_v41 = vsel %vm340_vm4, %v960_v55, %v964_v59  ;;  %v1008_v10 = vld [vmem:[%s1406_s1] sm:$0xff]  }
  0xa4   : > { %v970_v49 = vunpack.i.h.bf16 %v1246_v45  ;;  %v969_v50 = vunpack.i.l.bf16 %v1246_v45  ;;  %v974_v57 = vunpack.i.l.bf16 %v973_v46  ;;  %v975_v63 = vunpack.i.h.bf16 %v973_v46 }
  0xa5   : > { %v1115_v46 = vmov 0  }
  0xa6   : > { %464 = vrot.lane.b32.xlu0 %v433_v48, %s1114_s27  ;;  %v358_v62 = vsel %vm356_vm5, %v969_v50, %v970_v49  ;;  %v424_v12 = vsel %vm412_vm3, %v964_v59, %v974_v57  ;;  %v357_v18 = vsel %vm356_vm5, %v975_v63, %v969_v50  ;;  %v359_v36 = vsel %vm356_vm5, %v970_v49, %v974_v57 }
  0xa7   : > { %v978_v51 = vpop.permute.xlu0 %977  ;;  %v983_v52 = vpop.permute.xlu1 %982  ;;  %v422_v20 = vsel %vm412_vm3, %v342_v9, %v358_v62  ;;  %v421_v38 = vsel %vm412_vm3, %v341_v32, %v357_v18  ;;  %v423_v43 = vsel %vm412_vm3, %v343_v41, %v359_v36  ;;  %543 = vmatprep.mubr.bf16.mxu0 %v1115_v46  ;;  %1006 = vset.pattern.permute.xlu1 %v1115_v46 }
  0xa8   : > { %v980_v60 = vunpack.i.h.bf16 %v978_v51  ;;  %v979_v61 = vunpack.i.l.bf16 %v978_v51  ;;  %v985_v0 = vunpack.i.h.bf16 %v983_v52  ;;  %v984_v1 = vunpack.i.l.bf16 %v983_v52  ;;  %1007 = vset.pattern.permute.xlu0 %v1115_v46 }
  0xaa   : > { %v374_v14 = vsel %vm372_vm6, %v979_v61, %v980_v60  ;;  %v373_v24 = vsel %vm372_vm6, %v985_v0, %v979_v61  ;;  %v375_v37 = vsel %vm372_vm6, %v980_v60, %v984_v1 }
  0xab   : > { %v988_v3 = vpop.permute.xlu0 %987  ;;  %v993_v4 = vpop.permute.xlu1 %992 }
  0xac   : > { %v990_v5 = vunpack.i.h.bf16 %v988_v3  ;;  %v989_v6 = vunpack.i.l.bf16 %v988_v3  ;;  %v995_v7 = vunpack.i.h.bf16 %v993_v4  ;;  %v994_v8 = vunpack.i.l.bf16 %v993_v4 }
  0xae   : > { %v390_v15 = vsel %vm388_vm7, %v989_v6, %v990_v5  ;;  %v389_v16 = vsel %vm388_vm7, %v995_v7, %v989_v6  ;;  %v428_v17 = vsel %vm412_vm3, %v984_v1, %v994_v8  ;;  %v391_v28 = vsel %vm388_vm7, %v990_v5, %v994_v8 }
  0xaf   : > { %v440_v19 = vpack.c.bf16 %v428_v17, %v424_v12  ;;  %v426_v21 = vsel %vm412_vm3, %v374_v14, %v390_v15  ;;  %v998_v22 = vpop.permute.xlu0 %997  ;;  %v1003_v23 = vpop.permute.xlu1 %1002  ;;  %v425_v31 = vsel %vm412_vm3, %v373_v24, %v389_v16  ;;  %v427_v2 = vsel %vm412_vm3, %v375_v37, %v391_v28  ;;  %v595_v16 = vld [vmem:[%s1409_s4] sm:$0x7] }
  0xb0   : > { %v438_v25 = vpack.c.bf16 %v426_v21, %v422_v20  ;;  %v1000_v26 = vunpack.i.h.bf16 %v998_v22  ;;  %v999_v27 = vunpack.i.l.bf16 %v998_v22  ;;  %v1004_v29 = vunpack.i.l.bf16 %v1003_v23 }
  0xb1   : > { %478 = vrot.lane.b32.xlu1 %v440_v19, %s1114_s27  ;;  %v1005_v33 = vunpack.i.h.bf16 %v1003_v23  ;;  %v437_v40 = vpack.c.bf16 %v425_v31, %v421_v38  ;;  %v439_v47 = vpack.c.bf16 %v427_v2, %v423_v43 }
  0xb2   : > { %474 = vrot.lane.b32.xlu0 %v438_v25, %s1114_s27  ;;  %v406_v35 = vsel %vm404_vm8, %v999_v27, %v1000_v26  ;;  %v407_v42 = vsel %vm404_vm8, %v1000_v26, %v1004_v29  ;;  %v432_v51 = vsel %vm412_vm3, %v1004_v29, 0.0 }
  0xb3   : > { %v430_v39 = vsel %vm412_vm3, %v406_v35, 0.0  ;;  %v405_v45 = vsel %vm404_vm8, %v1005_v33, %v999_v27  ;;  %v431_v48 = vsel %vm412_vm3, %v407_v42, 0.0  ;;  %v444_v53 = vpack.c.bf16 %v1112_v11, %v432_v51 }
  0xb4   : > { %v442_v44 = vpack.c.bf16 %v1112_v11, %v430_v39  ;;  %v429_v49 = vsel %vm412_vm3, %v405_v45, 0.0  ;;  %v443_v50 = vpack.c.bf16 %v1112_v11, %v431_v48 }
  0xb5   : > { %468 = vrot.lane.b32.xlu1 %v435_v34, %s1114_s27  ;;  %v441_v52 = vpack.c.bf16 %v1112_v11, %v429_v49 }
  0xb6   : > { %472 = vrot.lane.b32.xlu0 %v437_v40, %s1114_s27 }
  0xb9   : > { %476 = vrot.lane.b32.xlu1 %v439_v47, %s1114_s27 }
  0xba   : > { %482 = vrot.lane.b32.xlu0 %v442_v44, %s1114_s27 }
  0xbd   : > { %484 = vrot.lane.b32.xlu1 %v443_v50, %s1114_s27 }
  0xbe   : > { %480 = vrot.lane.b32.xlu0 %v441_v52, %s1114_s27 }
  0xc1   : > { %486 = vrot.lane.b32.xlu1 %v444_v53, %s1114_s27  ;;  %s858_s27 = smul.u32 384, %s1095_s21  ;;  %s721_s21 = scalar_lea.sflag [#allocation7], %s252_s24 }
  0xc3   : > { %s1358_s10 = scalar_lea.hbm %s1410_s5, %s858_s27 }
 0x113   : > { %v471_v55 = vpop.permute.xlu1 %470 }
 0x114   : > { %v467_v54 = vpop.permute.xlu0 %466 }
 0x118   : > { %v465_v56 = vpop.permute.xlu0 %464 }
 0x119   : > { %v489_v63 = vsel %vm488_vm10, %v465_v56, %v467_v54 }
 0x123   : > { %v479_v57 = vpop.permute.xlu1 %478 }
 0x124   : > { %v475_v58 = vpop.permute.xlu0 %474 }
 0x127   : > { %v469_v59 = vpop.permute.xlu1 %468 }
 0x128   : > { %v473_v60 = vpop.permute.xlu0 %472  ;;  %v490_v61 = vsel %vm488_vm10, %v467_v54, %v469_v59  ;;  %v491_v62 = vsel %vm488_vm10, %v469_v59, %v471_v55 }
 0x129   : > { %511 = vmatprep.subr.bf16.mxu0 %v490_v61  ;;  %848 = vmatpush3.bf16.msra.mxu1 %v491_v62  ;;  %v492_v5 = vsel %vm488_vm10, %v473_v60, %v475_v58 }
 0x12a   : > { %512 = vmatpush1.bf16.msra.mxu0 %v489_v63  ;;  %849 = vmatprep.subr.bf16.mxu1 %v1112_v11 }
 0x12b   : > { %v477_v0 = vpop.permute.xlu1 %476 }
 0x12c   : > { %v483_v1 = vpop.permute.xlu0 %482  ;;  %v493_v3 = vsel %vm488_vm10, %v475_v58, %v477_v0  ;;  %v494_v4 = vsel %vm488_vm10, %v477_v0, %v479_v57 }
 0x12d   : > { %513 = vmatprep.subr.bf16.mxu0 %v493_v3  ;;  %850 = vmatpush3.bf16.msra.mxu1 %v494_v4 }
 0x12e   : > { %514 = vmatpush1.bf16.msra.mxu0 %v492_v5  ;;  %851 = vmatprep.subr.bf16.mxu1 %v1112_v11  ;;  %v597_v11 = vlaneseq  ;;  %v659_v5 = vld [vmem:[%s1408_s3 + $0x8] sm:$0xff] }
 0x12f   : > { %v485_v6 = vpop.permute.xlu1 %484 }
 0x130   : > { %v481_v7 = vpop.permute.xlu0 %480  ;;  %v496_v8 = vsel %vm488_vm10, %v483_v1, %v485_v6  ;;  %v598_v14 = vshrl.u32 %v597_v11, 7 }
 0x131   : > { %515 = vmatprep.subr.bf16.mxu0 %v496_v8  ;;  %v495_v9 = vsel %vm488_vm10, %v481_v7, %v483_v1  ;;  %v651_v1 = vld [vmem:[%s1407_s2 + $0x8] sm:$0xff]  ;;  %v650_v7 = vld [vmem:[%s1407_s2] sm:$0xff] }
 0x132   : > { %516 = vmatpush1.bf16.msra.mxu0 %v495_v9  ;;  %v599_v15 = vsub.s32 0, %v598_v14  ;;  %v603_v17 = vsub.s32 1, %v598_v14  ;;  %v607_v18 = vsub.s32 2, %v598_v14 }
 0x133   : > { %v487_v12 = vpop.permute.xlu1 %486 }
 0x134   : > { %v497_v13 = vsel %vm488_vm10, %v485_v6, %v487_v12  ;;  %v600_v19 = vrot.slane %v595_v16, %v599_v15  ;;  %v604_v20 = vrot.slane %v595_v16, %v603_v17  ;;  %v608_v22 = vrot.slane %v595_v16, %v607_v18  ;;  %v658_v12 = vld [vmem:[%s1408_s3] sm:$0xff] }
 0x135   : > { %834 = vmatmul.mubr.msk.bf16.vlgmr.msra.gmra.mrb[0].mxu0 %vm507_vm11, %v1008_v10  ;;  %852 = vmatpush3.bf16.msra.mxu1 %v497_v13 }
 0x138   : > { %854 = vmatmul.mubr.msk.bf16.vlgmr.msra.gmra.mrb[0].mxu1 %vm507_vm11, %v1008_v10 }
 0x208   : > { %v1321_v21 = vpop.f32.mrb[0].mxu0 }
 0x209   : > { %v612_v23 = vmul.f32 %v600_v19, %v1321_v21  ;;  %v1324_v24 = vpop.f32.mrb[1].mxu0 }
 0x20a   : > { %v613_v25 = vmul.f32 %v604_v20, %v1324_v24  ;;  %v1327_v26 = vpop.f32.mrb[2].mxu0 }
 0x20b   : > { %v626_v27 = vmul.f32 %v612_v23, %v1321_v21  ;;  %v615_v28 = vmul.f32 %v600_v19, %v1327_v26  ;;  %v551_v29 = vpop.f32.mrb[3].mxu0  ;;  %v1331_v30 = vpop.f32.mrb[0].mxu1 }
 0x20c   : > { %v627_v31 = vmul.f32 %v613_v25, %v1324_v24  ;;  %v616_v32 = vmul.f32 %v604_v20, %v551_v29  ;;  %v855_v33 = vpop.f32.mrb[1].mxu1  ;;  %v614_v34 = vmul.f32 %v608_v22, %v1331_v30  ;;  %v618_v35 = vadd.f32 %v613_v25, %v612_v23 }
 0x20d   : > { %v629_v36 = vmul.f32 %v615_v28, %v1327_v26  ;;  %v591_v37 = vpop.f32.mrb[2].mxu1 }
 0x20e   : > { %v630_v38 = vmul.f32 %v616_v32, %v551_v29  ;;  %v856_v39 = vpop.f32.mrb[3].mxu1  ;;  %v617_v40 = vmul.f32 %v608_v22, %v591_v37  ;;  %v622_v2 = vadd.f32 %v616_v32, %v615_v28  ;;  %v619_v41 = vadd.f32 %v618_v35, %v614_v34 }
 0x20f   : > { %v628_v42 = vmul.f32 %v614_v34, %v1331_v30  ;;  %v632_v43 = vadd.f32 %v627_v31, %v626_v27 }
 0x210   : > { %v623_v44 = vadd.f32 %v622_v2, %v617_v40  ;;  %v631_v45 = vmul.f32 %v617_v40, %v591_v37  ;;  %v636_v46 = vadd.f32 %v630_v38, %v629_v36 }
 0x211   : > { %v633_v47 = vadd.f32 %v632_v43, %v628_v42 }
 0x212   : > { %624 = vadd.xlane.f32.xlu0 %v623_v44  ;;  %v637_v48 = vadd.f32 %v636_v46, %v631_v45 }
 0x214   : > { %638 = vadd.xlane.f32.xlu1 %v637_v48 }
 0x216   : > { %620 = vadd.xlane.f32.xlu0 %v619_v41 }
 0x21a   : > { %634 = vadd.xlane.f32.xlu0 %v633_v47 }
 0x29f   : > { %v625_v49 = vpop.xlane.xlu0 %624 }
 0x2a0   : > { %v641_v50 = vmul.f32 0.00390625, %v625_v49 }
 0x2a1   : > { %v639_v51 = vpop.xlane.xlu1 %638 }
 0x2a2   : > { %v645_v52 = vmul.f32 %v641_v50, %v641_v50  ;;  %v643_v53 = vmul.f32 0.00390625, %v639_v51 }
 0x2a3   : > { %v621_v54 = vpop.xlane.xlu0 %620 }
 0x2a4   : > { %v647_v55 = vsub.f32 %v643_v53, %v645_v52  ;;  %v640_v56 = vmul.f32 0.00390625, %v621_v54 }
 0x2a6   : > { %v649_v57 = vmax.f32 %v647_v55, 0.0  ;;  %v644_v60 = vmul.f32 %v640_v56, %v640_v56 }
 0x2a7   : > { %v635_v58 = vpop.xlane.xlu0 %634 }
 0x2a8   : > { %v653_v59 = vadd.f32 1e-05, %v649_v57  ;;  %v642_v61 = vmul.f32 0.00390625, %v635_v58 }
 0x2aa   : > { %1009 = vrsqrt.f32 %v653_v59  ;;  %v646_v62 = vsub.f32 %v642_v61, %v644_v60 }
 0x2ac   : > { %v648_v63 = vmax.f32 %v646_v62, 0.0 }
 0x2ae   : > { %v652_v0 = vadd.f32 1e-05, %v648_v63 }
 0x2b0   : > { %1011 = vrsqrt.f32 %v652_v0 }
 0x2b4   : > { %v1010_v3 = vpop.eup %1009 }
 0x2b5   : > { %v657_v4 = vmul.f32 %v1010_v3, %v651_v1 }
 0x2b7   : > { %671 = vperm.xlu1 %1006, %v657_v4   ;;  %v661_v6 = vmul.f32 %v657_v4, %v641_v50 }
 0x2b9   : > { %v663_v8 = vsub.f32 %v659_v5, %v661_v6 }
 0x2ba   : > { %v1012_v9 = vpop.eup %1011 }
 0x2bb   : > { %687 = vperm.xlu0 %1007, %v663_v8   ;;  %v656_v10 = vmul.f32 %v1012_v9, %v650_v7 }
 0x2bd   : > { %666 = vperm.xlu1 %1006, %v656_v10   ;;  %v660_v13 = vmul.f32 %v656_v10, %v640_v56 }
 0x2bf   : > { %v662_v11 = vsub.f32 %v658_v12, %v660_v13 }
 0x2c1   : > { %682 = vperm.xlu1 %1006, %v662_v11  }
 0x336   : > { %v672_v14 = vpop.permute.xlu1 %671 }
 0x337   : > { %v677_v15 = vmul.f32 %v672_v14, %v1327_v26  ;;  %v678_v16 = vmul.f32 %v672_v14, %v551_v29  ;;  %v679_v17 = vmul.f32 %v672_v14, %v591_v37 }
 0x33a   : > { %v688_v18 = vpop.permute.xlu0 %687 }
 0x33b   : > { %v693_v19 = vadd.f32 %v688_v18, %v677_v15  ;;  %v694_v20 = vadd.f32 %v688_v18, %v678_v16  ;;  %v695_v22 = vadd.f32 %v688_v18, %v679_v17 }
 0x33c   : > { %v667_v29 = vpop.permute.xlu1 %666 }
 0x33d   : > { %v836_v23 = vmul.f32 -1.442695, %v693_v19  ;;  %v837_v25 = vmul.f32 -1.442695, %v694_v20  ;;  %v838_v27 = vmul.f32 -1.442695, %v695_v22  ;;  %v674_v36 = vmul.f32 %v667_v29, %v1321_v21 }
 0x33e   : > { %v675_v37 = vmul.f32 %v667_v29, %v1324_v24  ;;  %v676_v38 = vmul.f32 %v667_v29, %v1331_v30 }
 0x33f   : > { %1013 = vpow2.f32 %v836_v23 }
 0x340   : > { %1015 = vpow2.f32 %v837_v25  ;;  %v683_v35 = vpop.permute.xlu1 %682 }
 0x341   : > { %1017 = vpow2.f32 %v838_v27  ;;  %v690_v39 = vadd.f32 %v683_v35, %v674_v36  ;;  %v691_v2 = vadd.f32 %v683_v35, %v675_v37  ;;  %v692_v42 = vadd.f32 %v683_v35, %v676_v38 }
 0x349   : > { %v1014_v28 = vpop.eup %1013 }
 0x34a   : > { %v1016_v31 = vpop.eup %1015  ;;  %v705_v32 = vadd.f32 1.0, %v1014_v28 }
 0x34b   : > { %v1018_v33 = vpop.eup %1017  ;;  %v706_v34 = vadd.f32 1.0, %v1016_v31 }
 0x34c   : > { %v707_v26 = vadd.f32 1.0, %v1018_v33  ;;  %1019 = vrcp.f32 %v705_v32 }
 0x34d   : > { %1021 = vrcp.f32 %v706_v34 }
 0x34e   : > { %1023 = vrcp.f32 %v707_v26 }
 0x356   : > { %v1020_v40 = vpop.eup %1019 }
 0x357   : > { %v1022_v41 = vpop.eup %1021  ;;  %v714_v43 = vmul.f32 %v1020_v40, %v690_v39 }
 0x358   : > { %v1024_v44 = vpop.eup %1023  ;;  %v715_v45 = vmul.f32 %v1022_v41, %v691_v2 }
 0x359   : > { %v716_v46 = vmul.f32 %v1024_v44, %v692_v42  ;;  %717 = vst [vmem:[%s254_s29] sm:$0xff] %v714_v43 }
 0x35a   : > { %718 = vst [vmem:[%s254_s29 + $0x8] sm:$0xff] %v715_v45 }
 0x35b   : > { %719 = vst [vmem:[%s254_s29 + $0x10] sm:$0xff] %v716_v46 }
 0x35c   : > { %1038 = shalt.err (!%p1035_p5)
}
 0x35d   : > { %s1039_s15 = scalar_lea.hbm %s1358_s10, 384  ;;  %s1043_s24 = scalar_lea.hbm %s1410_s5, 768 }
 0x35e   : > { %p1040_p6 = scmp.ne.s32.totalorder %s1358_s10, %s1039_s15  ;;  %p1044_p10 = scmp.lt.u32.totalorder %s1358_s10, %s1410_s5 }
 0x35f   : > { %p1045_p11 = scmp.lt.u32.totalorder %s1043_s24, %s1039_s15  ;;  %p1047_p13 = scmp.lt.u32.totalorder %s1039_s15, %s1358_s10 }
 0x360   : > { %p1041_p7 = pnand %p1040_p6, %p1188_p4 }
 0x361   : > { %p1046_p12 = por %p1045_p11, %p1044_p10 }
 0x362   : > { %p1042_p9 = pneg %p1041_p7 }
 0x363   : > { %p1048_p0 = por %p1047_p13, %p1046_p12 }
 0x365   : > { %p1049_p1 = pnand %p1048_p0, %p1042_p9 }
 0x367   : > { %1052 = shalt.err (!%p1049_p1)
}
 0x368   : > { %859 = dma.vmem_to_hbm [thread:$0]  (%p1188_p4), %s1360_s7, 384, %s1358_s10, %s721_s21  }
 0x369 PF: > { %p865_p2 = scmp.ge.s32.totalorder %s1103_s23, 2  ;;  %s750_s29 = sand.u32 1, %s1083_s18  }
 0x36a   : > { %s751_s8 = scalar_lea.sflag [#allocation7], %s750_s29 }
 0x36b   : > { %p862_p3 = pnand %p865_p2, %p1195_p8 }
 0x36d   : > { %1078 = dma.done.wait (!%p862_p3), %s751_s8, 384  }
 0x36e   : > { %1080 = vsyncadd (!%p862_p3), %s751_s8, 4294966912  ;;  %s18_s23 = sadd.s32 1, %s1103_s23   ;;  %s1413_s18 = smov %s1087_s19 }
 0x36f   : > { %p15_p5 = scmp.ge.s32.totalorder %s18_s23, 4   ;;  %s1414_s19 = smov %s1091_s20 }
 0x370   : > { %s1415_s20 = smov %s1201_s6  ;;  %s1416_s21 = smov %s1099_s22 }
 0x371   : > { %s1417_s22 = smov %s1419_s26  ;;  %17 = sbr.rel (!%p15_p5) target bundleno = 4 (0x4), region = 79 }
 0x378   :  { %756 = vsyncpa [#allocation7], 1 }
 0x379   :  { %758 = vsyncpa [#allocation7 + $0x1], 1 }

</bundles_post_ra>
